<compile_context>
chip_gen: v5e
topology: v5e:2x2
jax: 0.10.0
libtpu: 0.0.40
codegen_flags: <defaults>
</compile_context>

<pallas_src>
import functools

import jax
import jax.numpy as jnp
from jax import lax
from jax.experimental import pallas as pl
from jax.experimental.pallas import tpu as pltpu

BN_EPS = 1e-5
_VPU_CONV_MAX_CIN = 16  # above this, the 1x1 conv goes to the MXU


# ----------------------------- Pallas kernel --------------------------------
def _transition_kernel(x_ref, w_ref, b_ref, wt_ref, pmat_ref,
                       pool_ref, bnd_ref, *, W):
    f32 = jnp.float32
    x = x_ref[...].astype(f32)              # (Nb, Cin, HW)  original dtype -> f32
    w = w_ref[...]                          # (Cout, Cin)    BN-folded conv weight
    b = b_ref[...]                          # (Cout, 1)      BN-folded conv bias
    wt = wt_ref[...]                        # (10, HW)       per-lane weight fields

    nb, cin, hw = x.shape
    cout = w.shape[0]

    # ---- 1x1 conv with folded BN (VPU broadcast-FMAs for tiny Cin) ----------
    if cin <= _VPU_CONV_MAX_CIN:
        y = w[None, :, 0:1] * x[:, 0:1, :]                  # (Nb, Cout, HW)
        for c in range(1, cin):
            y = y + w[None, :, c:c + 1] * x[:, c:c + 1, :]
    else:
        y = jnp.stack([jnp.dot(w, x[n], preferred_element_type=f32)
                       for n in range(nb)], axis=0)
    y = y + b[None, :, :]                                   # bias hoisted, once

    # ---- compact pooled output on the MXU (overlaps with VPU/XLU below) -----
    # TODO(synk): for very large H*W replace the dense (HW, HpWp) operator with
    # a separable / strided pooling; it is O(HW^2/4) storage.
    p = jnp.dot(y.reshape(nb * cout, hw), pmat_ref[...],
                preferred_element_type=f32)                 # (Nb*Cout, HpWp)
    pool_ref[...] = p.reshape(nb, cout, p.shape[-1]).astype(pool_ref.dtype)

    # ---- exact Upsample(AvgPool(y)) via lane rolls + scaled adds -------------
    # Per-lane weight fields (built in the wrapper) zero out every lane that a
    # circular roll contaminates across row/edge boundaries, so the result is
    # exact f32 everywhere.
    def roll(v, s):
        # jnp.roll lowers to minor-dim slices + concatenate (VPU/XLU); exact.
        return jnp.roll(v, s, axis=-1)

    we, wo, he, ho = wt[0:1], wt[1:2], wt[2:3], wt[3:4]
    cw_s, cw_l, cw_r = wt[4:5], wt[5:6], wt[6:7]
    ch_s, ch_u, ch_d = wt[7:8], wt[8:9], wt[9:10]

    # 2x2 block average replicated over the full-resolution grid.
    pair_w = y + we * roll(y, -1) + wo * roll(y, 1)
    pooled_field = 0.25 * (pair_w + he * roll(pair_w, -W) + ho * roll(pair_w, W))
    # Bilinear mix along W (0.75 self / 0.25 neighbor block, clamped at edges).
    mix_w = (cw_s * pooled_field
             + cw_l * roll(pooled_field, 2)
             + cw_r * roll(pooled_field, -2))
    # Bilinear mix along H.
    u = ch_s * mix_w + ch_u * roll(mix_w, 2 * W) + ch_d * roll(mix_w, -2 * W)

    bnd_ref[...] = jnp.abs(y - u).astype(bnd_ref.dtype)


# -------------------------- operator construction ---------------------------
def _pool1d(size):
    """(size//2, size) operator: average adjacent pairs (0.5, 0.5)."""
    half = size // 2
    i = jnp.arange(half)
    a = jnp.zeros((half, size), jnp.float32)
    return a.at[i, 2 * i].set(0.5).at[i, 2 * i + 1].set(0.5)


def _upsample_weight_fields(H, W):
    """(10, H*W) f32 per-lane weights for the exact roll-based pool+upsample."""
    HW = H * W
    f32 = jnp.float32
    wi = jnp.arange(HW, dtype=jnp.int32) % W
    hi = jnp.arange(HW, dtype=jnp.int32) // W
    we = (wi % 2 == 0).astype(f32)
    wo = 1.0 - we
    he = (hi % 2 == 0).astype(f32)
    ho = 1.0 - he
    w_edge = ((wi == 0) | (wi == W - 1)).astype(f32)
    h_edge = ((hi == 0) | (hi == H - 1)).astype(f32)
    cw_s = 0.75 + 0.25 * w_edge                 # self weight (1.0 at clamped edges)
    cw_l = 0.25 * we * (wi != 0).astype(f32)    # left pooled-block neighbor
    cw_r = 0.25 * wo * (wi != W - 1).astype(f32)  # right pooled-block neighbor
    ch_s = 0.75 + 0.25 * h_edge
    ch_u = 0.25 * he * (hi != 0).astype(f32)
    ch_d = 0.25 * ho * (hi != H - 1).astype(f32)
    return jnp.stack([we, wo, he, ho, cw_s, cw_l, cw_r, ch_s, ch_u, ch_d], axis=0)


def _pick_images_per_step(N, Cin, Cout, HW, HpWp, in_itemsize,
                          budget_bytes=8 << 20):
    """Largest divisor of N that fits the VMEM budget; keep grid >= 2 if N >= 2
    so dimension_semantics=("parallel",) can still span both v7x TensorCores."""
    io = 2 * (Cin * HW * in_itemsize + (Cout * HW + Cout * HpWp) * in_itemsize)
    interm = 10 * Cout * HW * 4
    per_img = max(1, io + interm)
    cap = max(1, budget_bytes // per_img)
    divisors = [d for d in range(1, N + 1) if N % d == 0 and d <= cap]
    preferred = [d for d in divisors if N // d >= 2] or divisors
    return max(preferred)


# --------------------------------- wrapper ----------------------------------
def transition_ensemble(x_nchw, gamma, beta, conv_w):
    """x_nchw: (N, Cin, H, W); conv_w: (Cout, Cin, 1, 1).
    Returns (pooled, boundary) in NCHW: the module's return value and
    self.boundary."""
    N, Cin, H, W = x_nchw.shape
    Cout = conv_w.shape[0]
    assert H % 2 == 0 and W % 2 == 0, "AvgPool2d(2,2)+Upsample(2x) needs even H, W"
    Hp, Wp = H // 2, W // 2
    HW, HpWp = H * W, Hp * Wp

    # Training-mode batch statistics (biased), cheap channel-wise XLA reduction.
    x32 = x_nchw.astype(jnp.float32)
    mean = jnp.mean(x32, axis=(0, 2, 3))
    var = jnp.mean(jnp.square(x32 - mean[None, :, None, None]), axis=(0, 2, 3))
    # TODO(synk): running_mean/running_var buffer updates (training-time side
    # effect of nn.BatchNorm2d) are not materialized; only the forward outputs
    # are reproduced.

    # Fold BN into the 1x1 conv:  conv(BN(x)) = W' @ x + b'
    scale = gamma.astype(jnp.float32) * lax.rsqrt(var + BN_EPS)          # (Cin,)
    shift = beta.astype(jnp.float32) - mean * scale                      # (Cin,)
    w2 = conv_w.reshape(Cout, Cin).astype(jnp.float32)
    w_fold = w2 * scale[None, :]                                         # (Cout, Cin)
    b_fold = (w2 @ shift).reshape(Cout, 1)                               # (Cout, 1)

    wt = _upsample_weight_fields(H, W)                    # (10, HW)
    pool_op = jnp.kron(_pool1d(H), _pool1d(W)).T          # (HW, HpWp)

    # Kernel input in its original dtype; spatial flattened onto lanes.
    x_flat = x_nchw.reshape(N, Cin, HW)
    out_dtype = x_nchw.dtype

    Nb = _pick_images_per_step(N, Cin, Cout, HW, HpWp, x_nchw.dtype.itemsize)
    grid = (N // Nb,)

    kernel = functools.partial(_transition_kernel, W=W)

    pooled_flat, boundary_flat = pl.pallas_call(
        kernel,
        grid=grid,
        in_specs=[
            pl.BlockSpec((Nb, Cin, HW), lambda n: (n, 0, 0)),   # x, Nb images/step
            pl.BlockSpec((Cout, Cin), lambda n: (0, 0)),        # W' (grid-invariant)
            pl.BlockSpec((Cout, 1), lambda n: (0, 0)),          # b'
            pl.BlockSpec((10, HW), lambda n: (0, 0)),           # per-lane weights
            pl.BlockSpec((HW, HpWp), lambda n: (0, 0)),         # pool operator
        ],
        out_specs=(
            pl.BlockSpec((Nb, Cout, HpWp), lambda n: (n, 0, 0)),
            pl.BlockSpec((Nb, Cout, HW), lambda n: (n, 0, 0)),  # lane-dense boundary
        ),
        out_shape=(
            jax.ShapeDtypeStruct((N, Cout, HpWp), out_dtype),
            jax.ShapeDtypeStruct((N, Cout, HW), out_dtype),
        ),
        compiler_params=pltpu.CompilerParams(
            dimension_semantics=("parallel",),        # shard batch across TCs
            vmem_limit_bytes=32 * 1024 * 1024,        # safe on v5e/v6e/v7x
        ),
    )(x_flat, w_fold, b_fold, wt, pool_op)

    pooled = pooled_flat.reshape(N, Cout, Hp, Wp)
    boundary = boundary_flat.reshape(N, Cout, H, W)
    return pooled, boundary


# ----------------------------- pure-JAX reference ----------------------------
def _reference(x, gamma, beta, conv_w):
    N, Cin, H, W = x.shape
    Cout = conv_w.shape[0]
    mean = jnp.mean(x, axis=(0, 2, 3), keepdims=True)
    var = jnp.mean((x - mean) ** 2, axis=(0, 2, 3), keepdims=True)
    xn = (x - mean) / jnp.sqrt(var + BN_EPS)
    xn = xn * gamma.reshape(1, Cin, 1, 1) + beta.reshape(1, Cin, 1, 1)
    y = jnp.einsum('nchw,oc->nohw', xn, conv_w.reshape(Cout, Cin),
                   precision=lax.Precision.HIGHEST)
    p = y.reshape(N, Cout, H // 2, 2, W // 2, 2).mean(axis=(3, 5))

    def up(a, axis):
        n = a.shape[axis]
        d = jnp.arange(2 * n)
        src = jnp.clip((d + 0.5) / 2.0 - 0.5, 0.0, n - 1.0)
        i0 = jnp.floor(src).astype(jnp.int32)
        i1 = jnp.minimum(i0 + 1, n - 1)
        lam = src - i0
        a0 = jnp.take(a, i0, axis=axis)
        a1 = jnp.take(a, i1, axis=axis)
        shape = [1] * a.ndim
        shape[axis] = 2 * n
        lam = lam.reshape(shape)
        return a0 * (1.0 - lam) + a1 * lam

    u = up(up(p, 2), 3)
    return p, jnp.abs(y - u)


# ----------------------------------- main ------------------------------------
if __name__ == "__main__":
    key = jax.random.PRNGKey(0)
    k1, k2, k3, k4 = jax.random.split(key, 4)

    N, Cin, H, W = 2, 4, 16, 16
    Cout = 8

    x = jax.random.normal(k1, (N, Cin, H, W), dtype=jnp.float32)
    gamma = 1.0 + 0.1 * jax.random.normal(k2, (Cin,), dtype=jnp.float32)
    beta = 0.1 * jax.random.normal(k3, (Cin,), dtype=jnp.float32)
    conv_w = (jax.random.normal(k4, (Cout, Cin, 1, 1), dtype=jnp.float32)
              / jnp.sqrt(jnp.float32(Cin)))

    pooled, boundary = jax.jit(transition_ensemble)(x, gamma, beta, conv_w)
    jax.block_until_ready((pooled, boundary))

    p_ref, bnd_ref = _reference(x, gamma, beta, conv_w)
    assert pooled.shape == (N, Cout, H // 2, W // 2)
    assert boundary.shape == (N, Cout, H, W)
    # The pooled output goes through one MXU contraction at default precision
    # (possible bf16 operand rounding) -> loose tolerance there.  The boundary
    # path is exact f32 on the VPU/XLU, so it gets a tight tolerance.
    assert jnp.allclose(pooled, p_ref, atol=2e-2, rtol=2e-2), \
        float(jnp.max(jnp.abs(pooled - p_ref)))
    assert jnp.allclose(boundary, bnd_ref, atol=1e-4, rtol=1e-4), \
        float(jnp.max(jnp.abs(boundary - bnd_ref)))

    print("KERNEL_OK")
</pallas_src>

<mosaic_0001>
module attributes {stable_mosaic.version = 11 : i64} {
  func.func @_transition_kernel(%arg0: i32, %arg1: memref<1x4x256xf32, #tpu.memory_space<vmem>>, %arg2: memref<8x4xf32, #tpu.memory_space<vmem>>, %arg3: memref<8x1xf32, #tpu.memory_space<vmem>>, %arg4: memref<10x256xf32, #tpu.memory_space<vmem>>, %arg5: memref<256x64xf32, #tpu.memory_space<vmem>>, %arg6: memref<1x8x64xf32, #tpu.memory_space<vmem>>, %arg7: memref<1x8x256xf32, #tpu.memory_space<vmem>>) attributes {dimension_semantics = [#tpu.dimension_semantics<parallel>], iteration_bounds = array<i64: 2>, scalar_prefetch = 0 : i64, scratch_operands = 0 : i64, tpu.core_type = #tpu.core_type<tc>, window_params = [{transform_indices = @transform_0, window_bounds = array<i64: 1, 4, 256>}, {pipeline_mode = #tpu.pipeline_mode<synchronous>, transform_indices = @transform_1, window_bounds = array<i64: 8, 4>}, {pipeline_mode = #tpu.pipeline_mode<synchronous>, transform_indices = @transform_2, window_bounds = array<i64: 8, 1>}, {pipeline_mode = #tpu.pipeline_mode<synchronous>, transform_indices = @transform_3, window_bounds = array<i64: 10, 256>}, {pipeline_mode = #tpu.pipeline_mode<synchronous>, transform_indices = @transform_4, window_bounds = array<i64: 256, 64>}, {transform_indices = @transform_5, window_bounds = array<i64: 1, 8, 64>}, {transform_indices = @transform_6, window_bounds = array<i64: 1, 8, 256>}]} {
    %c0 = arith.constant 0 : index
    %c0_0 = arith.constant 0 : index
    %c0_1 = arith.constant 0 : index
    %0 = vector.load %arg1[%c0, %c0_0, %c0_1] : memref<1x4x256xf32, #tpu.memory_space<vmem>>, vector<1x4x256xf32>
    %c0_2 = arith.constant 0 : index
    %c0_3 = arith.constant 0 : index
    %1 = vector.load %arg2[%c0_2, %c0_3] : memref<8x4xf32, #tpu.memory_space<vmem>>, vector<8x4xf32>
    %c0_4 = arith.constant 0 : index
    %c0_5 = arith.constant 0 : index
    %2 = vector.load %arg3[%c0_4, %c0_5] : memref<8x1xf32, #tpu.memory_space<vmem>>, vector<8x1xf32>
    %c0_6 = arith.constant 0 : index
    %c0_7 = arith.constant 0 : index
    %3 = vector.load %arg4[%c0_6, %c0_7] : memref<10x256xf32, #tpu.memory_space<vmem>>, vector<10x256xf32>
    %4 = vector.extract_strided_slice %1 {offsets = [0, 0], sizes = [8, 1], strides = [1, 1]} : vector<8x4xf32> to vector<8x1xf32>
    %5 = vector.shape_cast %4 : vector<8x1xf32> to vector<1x8x1xf32>
    %6 = vector.extract_strided_slice %0 {offsets = [0, 0, 0], sizes = [1, 1, 256], strides = [1, 1, 1]} : vector<1x4x256xf32> to vector<1x1x256xf32>
    %7 = vector.broadcast %5 : vector<1x8x1xf32> to vector<1x8x256xf32>
    %8 = vector.broadcast %6 : vector<1x1x256xf32> to vector<1x8x256xf32>
    %9 = arith.mulf %7, %8 : vector<1x8x256xf32>
    %10 = vector.extract_strided_slice %1 {offsets = [0, 1], sizes = [8, 1], strides = [1, 1]} : vector<8x4xf32> to vector<8x1xf32>
    %11 = vector.shape_cast %10 : vector<8x1xf32> to vector<1x8x1xf32>
    %12 = vector.extract_strided_slice %0 {offsets = [0, 1, 0], sizes = [1, 1, 256], strides = [1, 1, 1]} : vector<1x4x256xf32> to vector<1x1x256xf32>
    %13 = vector.broadcast %11 : vector<1x8x1xf32> to vector<1x8x256xf32>
    %14 = vector.broadcast %12 : vector<1x1x256xf32> to vector<1x8x256xf32>
    %15 = arith.mulf %13, %14 : vector<1x8x256xf32>
    %16 = arith.addf %9, %15 : vector<1x8x256xf32>
    %17 = vector.extract_strided_slice %1 {offsets = [0, 2], sizes = [8, 1], strides = [1, 1]} : vector<8x4xf32> to vector<8x1xf32>
    %18 = vector.shape_cast %17 : vector<8x1xf32> to vector<1x8x1xf32>
    %19 = vector.extract_strided_slice %0 {offsets = [0, 2, 0], sizes = [1, 1, 256], strides = [1, 1, 1]} : vector<1x4x256xf32> to vector<1x1x256xf32>
    %20 = vector.broadcast %18 : vector<1x8x1xf32> to vector<1x8x256xf32>
    %21 = vector.broadcast %19 : vector<1x1x256xf32> to vector<1x8x256xf32>
    %22 = arith.mulf %20, %21 : vector<1x8x256xf32>
    %23 = arith.addf %16, %22 : vector<1x8x256xf32>
    %24 = vector.extract_strided_slice %1 {offsets = [0, 3], sizes = [8, 1], strides = [1, 1]} : vector<8x4xf32> to vector<8x1xf32>
    %25 = vector.shape_cast %24 : vector<8x1xf32> to vector<1x8x1xf32>
    %26 = vector.extract_strided_slice %0 {offsets = [0, 3, 0], sizes = [1, 1, 256], strides = [1, 1, 1]} : vector<1x4x256xf32> to vector<1x1x256xf32>
    %27 = vector.broadcast %25 : vector<1x8x1xf32> to vector<1x8x256xf32>
    %28 = vector.broadcast %26 : vector<1x1x256xf32> to vector<1x8x256xf32>
    %29 = arith.mulf %27, %28 : vector<1x8x256xf32>
    %30 = arith.addf %23, %29 : vector<1x8x256xf32>
    %31 = vector.shape_cast %2 : vector<8x1xf32> to vector<1x8x1xf32>
    %32 = vector.broadcast %31 : vector<1x8x1xf32> to vector<1x8x256xf32>
    %33 = arith.addf %30, %32 : vector<1x8x256xf32>
    %34 = vector.shape_cast %33 : vector<1x8x256xf32> to vector<8x256xf32>
    %c0_8 = arith.constant 0 : index
    %c0_9 = arith.constant 0 : index
    %35 = vector.load %arg5[%c0_8, %c0_9] : memref<256x64xf32, #tpu.memory_space<vmem>>, vector<256x64xf32>
    %cst = arith.constant dense<0.000000e+00> : vector<8x64xf32>
    %36 = tpu.matmul %34, %35, %cst {dimension_numbers = #tpu.dot_dimension_numbers<[1], [0], [0], [1], [0, 0, 1, 1], [], []>} : vector<8x256xf32>, vector<256x64xf32>, vector<8x64xf32> -> vector<8x64xf32>
    %37 = vector.shape_cast %36 : vector<8x64xf32> to vector<1x8x64xf32>
    %c0_10 = arith.constant 0 : index
    %c0_11 = arith.constant 0 : index
    %c0_12 = arith.constant 0 : index
    %38 = vector.load %arg6[%c0_10, %c0_11, %c0_12] : memref<1x8x64xf32, #tpu.memory_space<vmem>>, vector<1x8x64xf32>
    tpu.vector_store %arg6[%c0_10, %c0_11, %c0_12], %37 {strides = array<i32>} : memref<1x8x64xf32, #tpu.memory_space<vmem>>, vector<1x8x64xf32>,
    %39 = vector.extract_strided_slice %3 {offsets = [0, 0], sizes = [1, 256], strides = [1, 1]} : vector<10x256xf32> to vector<1x256xf32>
    %40 = vector.extract_strided_slice %3 {offsets = [1, 0], sizes = [1, 256], strides = [1, 1]} : vector<10x256xf32> to vector<1x256xf32>
    %41 = vector.extract_strided_slice %3 {offsets = [2, 0], sizes = [1, 256], strides = [1, 1]} : vector<10x256xf32> to vector<1x256xf32>
    %42 = vector.extract_strided_slice %3 {offsets = [3, 0], sizes = [1, 256], strides = [1, 1]} : vector<10x256xf32> to vector<1x256xf32>
    %43 = vector.extract_strided_slice %3 {offsets = [4, 0], sizes = [1, 256], strides = [1, 1]} : vector<10x256xf32> to vector<1x256xf32>
    %44 = vector.extract_strided_slice %3 {offsets = [5, 0], sizes = [1, 256], strides = [1, 1]} : vector<10x256xf32> to vector<1x256xf32>
    %45 = vector.extract_strided_slice %3 {offsets = [6, 0], sizes = [1, 256], strides = [1, 1]} : vector<10x256xf32> to vector<1x256xf32>
    %46 = vector.extract_strided_slice %3 {offsets = [7, 0], sizes = [1, 256], strides = [1, 1]} : vector<10x256xf32> to vector<1x256xf32>
    %47 = vector.extract_strided_slice %3 {offsets = [8, 0], sizes = [1, 256], strides = [1, 1]} : vector<10x256xf32> to vector<1x256xf32>
    %48 = vector.extract_strided_slice %3 {offsets = [9, 0], sizes = [1, 256], strides = [1, 1]} : vector<10x256xf32> to vector<1x256xf32>
    %49 = vector.extract_strided_slice %33 {offsets = [0, 0, 1], sizes = [1, 8, 255], strides = [1, 1, 1]} : vector<1x8x256xf32> to vector<1x8x255xf32>
    %50 = vector.extract_strided_slice %33 {offsets = [0, 0, 0], sizes = [1, 8, 1], strides = [1, 1, 1]} : vector<1x8x256xf32> to vector<1x8x1xf32>
    %51 = tpu.concatenate %49, %50 in 2 : vector<1x8x255xf32>, vector<1x8x1xf32> -> vector<1x8x256xf32>
    %52 = vector.shape_cast %39 : vector<1x256xf32> to vector<1x1x256xf32>
    %53 = vector.broadcast %52 : vector<1x1x256xf32> to vector<1x8x256xf32>
    %54 = arith.mulf %53, %51 : vector<1x8x256xf32>
    %55 = arith.addf %33, %54 : vector<1x8x256xf32>
    %56 = vector.extract_strided_slice %33 {offsets = [0, 0, 255], sizes = [1, 8, 1], strides = [1, 1, 1]} : vector<1x8x256xf32> to vector<1x8x1xf32>
    %57 = vector.extract_strided_slice %33 {offsets = [0, 0, 0], sizes = [1, 8, 255], strides = [1, 1, 1]} : vector<1x8x256xf32> to vector<1x8x255xf32>
    %58 = tpu.concatenate %56, %57 in 2 : vector<1x8x1xf32>, vector<1x8x255xf32> -> vector<1x8x256xf32>
    %59 = vector.shape_cast %40 : vector<1x256xf32> to vector<1x1x256xf32>
    %60 = vector.broadcast %59 : vector<1x1x256xf32> to vector<1x8x256xf32>
    %61 = arith.mulf %60, %58 : vector<1x8x256xf32>
    %62 = arith.addf %55, %61 : vector<1x8x256xf32>
    %63 = vector.extract_strided_slice %62 {offsets = [0, 0, 16], sizes = [1, 8, 240], strides = [1, 1, 1]} : vector<1x8x256xf32> to vector<1x8x240xf32>
    %64 = vector.extract_strided_slice %62 {offsets = [0, 0, 0], sizes = [1, 8, 16], strides = [1, 1, 1]} : vector<1x8x256xf32> to vector<1x8x16xf32>
    %65 = tpu.concatenate %63, %64 in 2 : vector<1x8x240xf32>, vector<1x8x16xf32> -> vector<1x8x256xf32>
    %66 = vector.shape_cast %41 : vector<1x256xf32> to vector<1x1x256xf32>
    %67 = vector.broadcast %66 : vector<1x1x256xf32> to vector<1x8x256xf32>
    %68 = arith.mulf %67, %65 : vector<1x8x256xf32>
    %69 = arith.addf %62, %68 : vector<1x8x256xf32>
    %70 = vector.extract_strided_slice %62 {offsets = [0, 0, 240], sizes = [1, 8, 16], strides = [1, 1, 1]} : vector<1x8x256xf32> to vector<1x8x16xf32>
    %71 = vector.extract_strided_slice %62 {offsets = [0, 0, 0], sizes = [1, 8, 240], strides = [1, 1, 1]} : vector<1x8x256xf32> to vector<1x8x240xf32>
    %72 = tpu.concatenate %70, %71 in 2 : vector<1x8x16xf32>, vector<1x8x240xf32> -> vector<1x8x256xf32>
    %73 = vector.shape_cast %42 : vector<1x256xf32> to vector<1x1x256xf32>
    %74 = vector.broadcast %73 : vector<1x1x256xf32> to vector<1x8x256xf32>
    %75 = arith.mulf %74, %72 : vector<1x8x256xf32>
    %76 = arith.addf %69, %75 : vector<1x8x256xf32>
    %cst_13 = arith.constant 2.500000e-01 : f32
    %77 = vector.broadcast %cst_13 : f32 to vector<1x8x256xf32>
    %78 = arith.mulf %77, %76 : vector<1x8x256xf32>
    %79 = vector.shape_cast %43 : vector<1x256xf32> to vector<1x1x256xf32>
    %80 = vector.broadcast %79 : vector<1x1x256xf32> to vector<1x8x256xf32>
    %81 = arith.mulf %80, %78 : vector<1x8x256xf32>
    %82 = vector.extract_strided_slice %78 {offsets = [0, 0, 254], sizes = [1, 8, 2], strides = [1, 1, 1]} : vector<1x8x256xf32> to vector<1x8x2xf32>
    %83 = vector.extract_strided_slice %78 {offsets = [0, 0, 0], sizes = [1, 8, 254], strides = [1, 1, 1]} : vector<1x8x256xf32> to vector<1x8x254xf32>
    %84 = tpu.concatenate %82, %83 in 2 : vector<1x8x2xf32>, vector<1x8x254xf32> -> vector<1x8x256xf32>
    %85 = vector.shape_cast %44 : vector<1x256xf32> to vector<1x1x256xf32>
    %86 = vector.broadcast %85 : vector<1x1x256xf32> to vector<1x8x256xf32>
    %87 = arith.mulf %86, %84 : vector<1x8x256xf32>
    %88 = arith.addf %81, %87 : vector<1x8x256xf32>
    %89 = vector.extract_strided_slice %78 {offsets = [0, 0, 2], sizes = [1, 8, 254], strides = [1, 1, 1]} : vector<1x8x256xf32> to vector<1x8x254xf32>
    %90 = vector.extract_strided_slice %78 {offsets = [0, 0, 0], sizes = [1, 8, 2], strides = [1, 1, 1]} : vector<1x8x256xf32> to vector<1x8x2xf32>
    %91 = tpu.concatenate %89, %90 in 2 : vector<1x8x254xf32>, vector<1x8x2xf32> -> vector<1x8x256xf32>
    %92 = vector.shape_cast %45 : vector<1x256xf32> to vector<1x1x256xf32>
    %93 = vector.broadcast %92 : vector<1x1x256xf32> to vector<1x8x256xf32>
    %94 = arith.mulf %93, %91 : vector<1x8x256xf32>
    %95 = arith.addf %88, %94 : vector<1x8x256xf32>
    %96 = vector.shape_cast %46 : vector<1x256xf32> to vector<1x1x256xf32>
    %97 = vector.broadcast %96 : vector<1x1x256xf32> to vector<1x8x256xf32>
    %98 = arith.mulf %97, %95 : vector<1x8x256xf32>
    %99 = vector.extract_strided_slice %95 {offsets = [0, 0, 224], sizes = [1, 8, 32], strides = [1, 1, 1]} : vector<1x8x256xf32> to vector<1x8x32xf32>
    %100 = vector.extract_strided_slice %95 {offsets = [0, 0, 0], sizes = [1, 8, 224], strides = [1, 1, 1]} : vector<1x8x256xf32> to vector<1x8x224xf32>
    %101 = tpu.concatenate %99, %100 in 2 : vector<1x8x32xf32>, vector<1x8x224xf32> -> vector<1x8x256xf32>
    %102 = vector.shape_cast %47 : vector<1x256xf32> to vector<1x1x256xf32>
    %103 = vector.broadcast %102 : vector<1x1x256xf32> to vector<1x8x256xf32>
    %104 = arith.mulf %103, %101 : vector<1x8x256xf32>
    %105 = arith.addf %98, %104 : vector<1x8x256xf32>
    %106 = vector.extract_strided_slice %95 {offsets = [0, 0, 32], sizes = [1, 8, 224], strides = [1, 1, 1]} : vector<1x8x256xf32> to vector<1x8x224xf32>
    %107 = vector.extract_strided_slice %95 {offsets = [0, 0, 0], sizes = [1, 8, 32], strides = [1, 1, 1]} : vector<1x8x256xf32> to vector<1x8x32xf32>
    %108 = tpu.concatenate %106, %107 in 2 : vector<1x8x224xf32>, vector<1x8x32xf32> -> vector<1x8x256xf32>
    %109 = vector.shape_cast %48 : vector<1x256xf32> to vector<1x1x256xf32>
    %110 = vector.broadcast %109 : vector<1x1x256xf32> to vector<1x8x256xf32>
    %111 = arith.mulf %110, %108 : vector<1x8x256xf32>
    %112 = arith.addf %105, %111 : vector<1x8x256xf32>
    %113 = arith.subf %33, %112 : vector<1x8x256xf32>
    %114 = math.absf %113 : vector<1x8x256xf32>
    %c0_14 = arith.constant 0 : index
    %c0_15 = arith.constant 0 : index
    %c0_16 = arith.constant 0 : index
    %115 = vector.load %arg7[%c0_14, %c0_15, %c0_16] : memref<1x8x256xf32, #tpu.memory_space<vmem>>, vector<1x8x256xf32>
    tpu.vector_store %arg7[%c0_14, %c0_15, %c0_16], %114 {strides = array<i32>} : memref<1x8x256xf32, #tpu.memory_space<vmem>>, vector<1x8x256xf32>,
    return
  }
  func.func @transform_0(%arg0: i32) -> (i32, i32, i32) {
    %c0_i32 = arith.constant 0 : i32
    %c0_i32_0 = arith.constant 0 : i32
    %c0_i32_1 = arith.constant 0 : i32
    return %arg0, %c0_i32, %c0_i32_0 : i32, i32, i32
  }
  func.func @transform_1(%arg0: i32) -> (i32, i32) {
    %c0_i32 = arith.constant 0 : i32
    %c0_i32_0 = arith.constant 0 : i32
    %c0_i32_1 = arith.constant 0 : i32
    return %c0_i32, %c0_i32_0 : i32, i32
  }
  func.func @transform_2(%arg0: i32) -> (i32, i32) {
    %c0_i32 = arith.constant 0 : i32
    %c0_i32_0 = arith.constant 0 : i32
    %c0_i32_1 = arith.constant 0 : i32
    return %c0_i32, %c0_i32_0 : i32, i32
  }
  func.func @transform_3(%arg0: i32) -> (i32, i32) {
    %c0_i32 = arith.constant 0 : i32
    %c0_i32_0 = arith.constant 0 : i32
    %c0_i32_1 = arith.constant 0 : i32
    return %c0_i32, %c0_i32_0 : i32, i32
  }
  func.func @transform_4(%arg0: i32) -> (i32, i32) {
    %c0_i32 = arith.constant 0 : i32
    %c0_i32_0 = arith.constant 0 : i32
    %c0_i32_1 = arith.constant 0 : i32
    return %c0_i32, %c0_i32_0 : i32, i32
  }
  func.func @transform_5(%arg0: i32) -> (i32, i32, i32) {
    %c0_i32 = arith.constant 0 : i32
    %c0_i32_0 = arith.constant 0 : i32
    %c0_i32_1 = arith.constant 0 : i32
    return %arg0, %c0_i32, %c0_i32_0 : i32, i32, i32
  }
  func.func @transform_6(%arg0: i32) -> (i32, i32, i32) {
    %c0_i32 = arith.constant 0 : i32
    %c0_i32_0 = arith.constant 0 : i32
    %c0_i32_1 = arith.constant 0 : i32
    return %arg0, %c0_i32, %c0_i32_0 : i32, i32, i32
  }
}

</mosaic_0001>

<bundles_post_ra>
// kernel: transition_ensemble.1
= control target key start
LH: loop header
LB: loop body
LE: loop exit
PB: predicated region body
PF: predicated region fallthrough
CT: control target
= control target key end

     0   :  { %s740_s21 = smov 0   ;;  %s920_s0 = inlined_call_operand.vmem [shape: f32[2,4,256], index: 0, kind: input, shape index: {}]   ;;  %s921_s1 = inlined_call_operand.vmem [shape: f32[8,4], index: 1, kind: input, shape index: {}]   ;;  %s922_s2 = inlined_call_operand.vmem [shape: f32[8,1], index: 2, kind: input, shape index: {}]   ;;  %s923_s3 = inlined_call_operand.vmem [shape: f32[10,256], index: 3, kind: input, shape index: {}]   ;;  %s924_s4 = inlined_call_operand.vmem [shape: f32[256,64], index: 4, kind: input, shape index: {}]   ;;  %s925_s5 = inlined_call_operand.vmem [shape: f32[2,8,64], index: 5, kind: output, shape index: {0}]   ;;  %s926_s6 = inlined_call_operand.vmem [shape: f32[2,8,256], index: 6, kind: output, shape index: {1}]  }
   0x1 LB: > { %s645_s22 = sadd.s32 4294967295, %s691_s21   ;;  %p649_p0 = scmp.ge.s32.totalorder %s691_s21, 1  ;;  %s691_s21 = sphi %s740_s21, %s17_s21  }
   0x2   : > { %p215_p1 = scmp.lt.s32.totalorder %s691_s21, 3 }
   0x4   : > { %p216_p2 = pnand %p649_p0, %p215_p1 }
   0x5   : > { %p249_p3 = scmp.lt.s32.totalorder (!%p216_p2), %s645_s22, 1  ;;  %s697_s29 = smov (!%p216_p2), 127  }
   0x6   : > { %219 = sbr.rel (%p216_p2) target bundleno = 656 (0x290), region = 40  ;;  %s698_s30 = smov (!%p216_p2), 1  }
   0x7   : > { %s699_s11 = smov (!%p216_p2), 112   ;;  %s700_s12 = smov (!%p216_p2), 16  }
   0x8   : > { %s701_s16 = smov (!%p216_p2), 2   ;;  %s702_s17 = smov (!%p216_p2), 126  }
   0x9   : > { %s703_s18 = smov (!%p216_p2), 32   ;;  %s704_s19 = smov (!%p216_p2), 96  }
   0xb   : > { %v264_v0 = vld [vmem:[%s921_s1] sm:$0xff]  ;;  %v693_v1 = vmov 0   ;;  %v694_v2 = vmov 2   ;;  %v348_v4 = vld [vmem:[%s924_s4 + $0x78] sm:$0xff]  ;;  %v347_v6 = vld [vmem:[%s924_s4 + $0x70] sm:$0xff]  ;;  %v695_v13 = vmov 1  }
   0xc   : > { %679 = vset.pattern.permute.xlu0 %v693_v1  ;;  %681 = vset.pattern.permute.xlu1 %v694_v2  ;;  %v265_v3 = vld [vmem:[%s922_s2] sm:$0xff]  ;;  %v364_v5 = vld [vmem:[%s924_s4 + $0xf8] sm:$0xff]  ;;  %v363_v7 = vld [vmem:[%s924_s4 + $0xf0] sm:$0xff]  ;;  %v696_v14 = vmov 3   ;;  %s928_s22 = smov (!%p249_p3, %s645_s22), 1  ;;  %vm413_vm0 = vcmask 1039360  }
   0xd   : > { %272 = vperm.xlu0 %679, %v264_v0   ;;  %299 = vperm.xlu1 %681, %v264_v0   ;;  %v346_v8 = vld [vmem:[%s924_s4 + $0x68] sm:$0xff]  ;;  %v345_v10 = vld [vmem:[%s924_s4 + $0x60] sm:$0xff]  ;;  %v344_v12 = vld [vmem:[%s924_s4 + $0x58] sm:$0xff]  ;;  %s657_s25 = sshll.u32 %s928_s22, 3  ;;  %vm430_vm1 = vcmask 7168   ;;  %vm405_vm2 = vcmask 523264  }
   0xe   : > { %683 = vset.pattern.permute.xlu2 %v693_v1  ;;  %365 = vmatpush.msra.mxu0 %v348_v4  ;;  %v362_v9 = vld [vmem:[%s924_s4 + $0xe8] sm:$0xff]  ;;  %v361_v11 = vld [vmem:[%s924_s4 + $0xe0] sm:$0xff]  ;;  %v360_v15 = vld [vmem:[%s924_s4 + $0xd8] sm:$0xff]  ;;  %s253_s28 = scalar_lea.vmem %s920_s0, %s657_s25  ;;  %s257_s15 = scalar_lea.vmem %s925_s5, %s657_s25  ;;  %vm447_vm3 = vcmask 916480   ;;  %vm464_vm4 = vcmask 130048   ;;  %vm503_vm5 = vcmask 1031168  }
   0xf   : > { %328 = vperm.xlu2 %683, %v265_v3   ;;  %385 = vmatpush.msra.mxu1 %v364_v5  ;;  %v343_v16 = vld [vmem:[%s924_s4 + $0x50] sm:$0xff]  ;;  %v342_v18 = vld [vmem:[%s924_s4 + $0x48] sm:$0xff]  ;;  %v341_v20 = vld [vmem:[%s924_s4 + $0x40] sm:$0xff]  ;;  %vm488_vm6 = vcmask 15360   ;;  %vm526_vm7 = vcmask 261120   ;;  %vm541_vm8 = vcmask 785408  }
  0x10   : > { %366 = vmatpush.msra.mxu0 %v347_v6  ;;  %v359_v17 = vld [vmem:[%s924_s4 + $0xd0] sm:$0xff]  ;;  %v358_v19 = vld [vmem:[%s924_s4 + $0xc8] sm:$0xff]  ;;  %v357_v21 = vld [vmem:[%s924_s4 + $0xc0] sm:$0xff]  ;;  %s658_s26 = sshll.u32 %s928_s22, 4 }
  0x11   : > { %386 = vmatpush.msra.mxu1 %v363_v7  ;;  %v340_v22 = vld [vmem:[%s924_s4 + $0x38] sm:$0xff]  ;;  %v339_v24 = vld [vmem:[%s924_s4 + $0x30] sm:$0xff]  ;;  %v338_v26 = vld [vmem:[%s924_s4 + $0x28] sm:$0xff] }
  0x12   : > { %367 = vmatpush.msra.mxu0 %v346_v8  ;;  %v356_v23 = vld [vmem:[%s924_s4 + $0xb8] sm:$0xff]  ;;  %v355_v25 = vld [vmem:[%s924_s4 + $0xb0] sm:$0xff]  ;;  %v354_v27 = vld [vmem:[%s924_s4 + $0xa8] sm:$0xff] }
  0x13   : > { %387 = vmatpush.msra.mxu1 %v362_v9  ;;  %v337_v28 = vld [vmem:[%s924_s4 + $0x20] sm:$0xff]  ;;  %v336_v30 = vld [vmem:[%s924_s4 + $0x18] sm:$0xff]  ;;  %v335_v32 = vld [vmem:[%s924_s4 + $0x10] sm:$0xff] }
  0x14   : > { %368 = vmatpush.msra.mxu0 %v345_v10  ;;  %v353_v29 = vld [vmem:[%s924_s4 + $0xa0] sm:$0xff]  ;;  %v352_v31 = vld [vmem:[%s924_s4 + $0x98] sm:$0xff]  ;;  %v351_v33 = vld [vmem:[%s924_s4 + $0x90] sm:$0xff] }
  0x15   : > { %680 = vset.pattern.permute.xlu0 %v695_v13  ;;  %682 = vset.pattern.permute.xlu1 %v696_v14  ;;  %v334_v34 = vld [vmem:[%s924_s4 + $0x8] sm:$0xff]  ;;  %v333_v36 = vld [vmem:[%s924_s4] sm:$0xff] }
  0x16   : > { %285 = vperm.xlu0 %680, %v264_v0   ;;  %313 = vperm.xlu1 %682, %v264_v0   ;;  %v350_v35 = vld [vmem:[%s924_s4 + $0x88] sm:$0xff]  ;;  %v349_v37 = vld [vmem:[%s924_s4 + $0x80] sm:$0xff] }
  0x17   : > { %388 = vmatpush.msra.mxu1 %v361_v11  ;;  %369 = vmatpush.msra.mxu0 %v344_v12  ;;  %v263_v38 = vld [vmem:[%s253_s28] sm:$0xff]  ;;  %v880_v14 = vld [vmem:[%s923_s3 + $0x8] sm:$0xff] }
  0x18   : > { %v276_v41 = vperm.slane %v263_v38, 0  ;;  %v277_v42 = vperm.slane %v263_v38, 4  ;;  %v288_v43 = vperm.slane %v263_v38, 1  ;;  %v289_v44 = vperm.slane %v263_v38, 5  ;;  %v875_v13 = vld [vmem:[%s923_s3] sm:$0xff] }
  0x19   : > { %389 = vmatpush.msra.mxu1 %v360_v15  ;;  %370 = vmatpush.msra.mxu0 %v343_v16  ;;  %v302_v45 = vperm.slane %v263_v38, 2  ;;  %v303_v46 = vperm.slane %v263_v38, 6  ;;  %v316_v47 = vperm.slane %v263_v38, 3  ;;  %v317_v48 = vperm.slane %v263_v38, 7 }
  0x1a   : > { %v280_v49 = vperm.slane %v276_v41, 0  ;;  %v281_v50 = vperm.slane %v277_v42, 0  ;;  %v292_v51 = vperm.slane %v288_v43, 1  ;;  %v293_v52 = vperm.slane %v289_v44, 1 }
  0x1b   : > { %390 = vmatpush.msra.mxu1 %v359_v17  ;;  %371 = vmatpush.msra.mxu0 %v342_v18  ;;  %v306_v53 = vperm.slane %v302_v45, 2  ;;  %v307_v54 = vperm.slane %v303_v46, 2  ;;  %v320_v55 = vperm.slane %v316_v47, 3  ;;  %v321_v56 = vperm.slane %v317_v48, 3 }
  0x1c   : > { %v419_v15 = vperm.slane %v875_v13, 0  ;;  %v420_v16 = vperm.slane %v880_v14, 0  ;;  %v435_v18 = vperm.slane %v875_v13, 1  ;;  %v469_v45 = vperm.slane %v875_v13, 3 }
  0x1d   : > { %391 = vmatpush.msra.mxu1 %v358_v19  ;;  %372 = vmatpush.msra.mxu0 %v341_v20  ;;  %v436_v19 = vperm.slane %v880_v14, 1  ;;  %v470_v46 = vperm.slane %v880_v14, 3 }
  0x1e   : > { %684 = vset.pattern.permute.xlu0 %v693_v1 }
  0x1f   : > { %392 = vmatpush.msra.mxu1 %v357_v21  ;;  %373 = vmatpush.msra.mxu0 %v340_v22 }
  0x21   : > { %393 = vmatpush.msra.mxu1 %v356_v23  ;;  %374 = vmatpush.msra.mxu0 %v339_v24 }
  0x23   : > { %394 = vmatpush.msra.mxu1 %v355_v25  ;;  %375 = vmatpush.msra.mxu0 %v338_v26 }
  0x25   : > { %395 = vmatpush.msra.mxu1 %v354_v27  ;;  %376 = vmatpush.msra.mxu0 %v337_v28 }
  0x27   : > { %396 = vmatpush.msra.mxu1 %v353_v29  ;;  %377 = vmatpush.msra.mxu0 %v336_v30 }
  0x29   : > { %397 = vmatpush.msra.mxu1 %v352_v31  ;;  %378 = vmatpush.msra.mxu0 %v335_v32 }
  0x2b   : > { %398 = vmatpush.msra.mxu1 %v351_v33  ;;  %379 = vmatpush.msra.mxu0 %v334_v34 }
  0x2d   : > { %399 = vmatpush.msra.mxu1 %v350_v35  ;;  %380 = vmatpush.msra.mxu0 %v333_v36 }
  0x2f   : > { %400 = vmatpush.msra.mxu1 %v349_v37 }
  0x69   : > { %v329_v7 = vpop.permute.xlu2 %328 }
  0x7f   : > { %v273_v39 = vpop.permute.xlu0 %272  ;;  %v300_v40 = vpop.permute.xlu1 %299 }
  0x80   : > { %v282_v59 = vmul.f32 %v280_v49, %v273_v39  ;;  %v283_v60 = vmul.f32 %v281_v50, %v273_v39  ;;  %v308_v63 = vmul.f32 %v306_v53, %v300_v40  ;;  %v309_v0 = vmul.f32 %v307_v54, %v300_v40 }
  0x81   : > { %v453_v39 = vperm.slane %v875_v13, 2  ;;  %v454_v40 = vperm.slane %v880_v14, 2 }
  0x88   : > { %v286_v57 = vpop.permute.xlu0 %285  ;;  %v314_v58 = vpop.permute.xlu1 %313 }
  0x89   : > { %v294_v61 = vmul.f32 %v292_v51, %v286_v57  ;;  %v295_v62 = vmul.f32 %v293_v52, %v286_v57  ;;  %v322_v3 = vmul.f32 %v320_v55, %v314_v58  ;;  %v323_v4 = vmul.f32 %v321_v56, %v314_v58 }
  0x8b   : > { %v296_v1 = vadd.f32 %v294_v61, %v282_v59  ;;  %v297_v2 = vadd.f32 %v295_v62, %v283_v60  ;;  %v477_v60 = vperm.slane %v875_v13, 4  ;;  %v478_v61 = vperm.slane %v880_v14, 4 }
  0x8c   : > { %v493_v62 = vperm.slane %v875_v13, 5 }
  0x8d   : > { %v310_v5 = vadd.f32 %v308_v63, %v296_v1  ;;  %v311_v6 = vadd.f32 %v309_v0, %v297_v2  ;;  %v494_v63 = vperm.slane %v880_v14, 5  ;;  %v509_v2 = vperm.slane %v875_v13, 6 }
  0x8f   : > { %v324_v8 = vadd.f32 %v322_v3, %v310_v5  ;;  %v325_v9 = vadd.f32 %v323_v4, %v311_v6  ;;  %v510_v3 = vperm.slane %v880_v14, 6 }
  0x91   : > { %v862_v10 = vadd.f32 %v329_v7, %v324_v8  ;;  %v864_v11 = vadd.f32 %v329_v7, %v325_v9 }
  0x93   : > { %411 = vrot.lane.b32.xlu1 %v864_v11, %s697_s29  ;;  %401 = vmatmul.f32.vlgmr.msra.gmra.mxu1 %v864_v11 }
  0x94   : > { %428 = vrot.lane.b32.xlu0 %v862_v10, %s698_s30  ;;  %409 = vrot.lane.b32.xlu2 %v862_v10, %s697_s29  ;;  %s262_s29 = scalar_lea.vmem %s926_s6, %s658_s26 }
  0x95   : > { %381 = vmatmul.f32.vlgmr.msra.gmra.mxu0 %v862_v10 }
  0x9c   : > { %425 = vrot.lane.b32.xlu2 %v864_v11, %s698_s30 }
  0xee   : > { %v410_v12 = vpop.permute.xlu2 %409 }
  0xf6   : > { %v426_v20 = vpop.permute.xlu2 %425 }
 0x105   : > { %v412_v17 = vpop.permute.xlu1 %411 }
 0x106   : > { %v414_v21 = vsel %vm413_vm0, %v410_v12, %v412_v17  ;;  %v418_v22 = vsel %vm413_vm0, %v412_v17, %v410_v12  ;;  %v429_v23 = vpop.permute.xlu0 %428 }
 0x107   : > { %v421_v24 = vmul.f32 %v419_v15, %v414_v21  ;;  %v422_v25 = vmul.f32 %v420_v16, %v418_v22  ;;  %v431_v26 = vsel %vm430_vm1, %v429_v23, %v426_v20  ;;  %v434_v27 = vsel %vm430_vm1, %v426_v20, %v429_v23  ;;  %v268_v23 = vld [vmem:[%s923_s3 + $0x10] sm:$0x3] }
 0x108   : > { %v437_v30 = vmul.f32 %v435_v18, %v434_v27  ;;  %v438_v31 = vmul.f32 %v436_v19, %v431_v26  ;;  %v531_v27 = vperm.slane %v268_v23, 0 }
 0x109   : > { %v423_v28 = vadd.f32 %v421_v24, %v862_v10  ;;  %v424_v29 = vadd.f32 %v422_v25, %v864_v11  ;;  %v269_v24 = vld [vmem:[%s923_s3 + $0x18] sm:$0x3] }
 0x10b   : > { %v439_v32 = vadd.f32 %v437_v30, %v423_v28  ;;  %v440_v33 = vadd.f32 %v438_v31, %v424_v29  ;;  %v532_v28 = vperm.slane %v269_v24, 0  ;;  %v515_v31 = vperm.slane %v875_v13, 7 }
 0x10d   : > { %443 = vrot.lane.b32.xlu1 %v439_v32, %s699_s11  ;;  %459 = vrot.lane.b32.xlu0 %v440_v33, %s700_s12 }
 0x10e   : > { %445 = vrot.lane.b32.xlu2 %v440_v33, %s699_s11 }
 0x110   : > { %v402_v34 = vpop.f32.mrf.mxu1 }
 0x112   : > { %v382_v35 = vpop.f32.mrf.mxu0 }
 0x113   : > { %v403_v36 = vadd.f32 %v402_v34, %v382_v35  ;;  %v547_v35 = vperm.slane %v268_v23, 1 }
 0x115   : > { %406 = vst.msk [vmem:[%s257_s15] sm:$0xff] %vm405_vm2, %v403_v36  ;;  %462 = vrot.lane.b32.xlu1 %v439_v32, %s700_s12  ;;  %v548_v36 = vperm.slane %v269_v24, 1 }
 0x168   : > { %v446_v38 = vpop.permute.xlu2 %445 }
 0x17f   : > { %v444_v37 = vpop.permute.xlu1 %443  ;;  %v460_v47 = vpop.permute.xlu0 %459 }
 0x180   : > { %v448_v41 = vsel %vm447_vm3, %v444_v37, %v446_v38  ;;  %v452_v42 = vsel %vm447_vm3, %v446_v38, %v444_v37 }
 0x181   : > { %v455_v43 = vmul.f32 %v453_v39, %v448_v41  ;;  %v456_v44 = vmul.f32 %v454_v40, %v452_v42 }
 0x183   : > { %v457_v51 = vadd.f32 %v455_v43, %v439_v32  ;;  %v458_v52 = vadd.f32 %v456_v44, %v440_v33  ;;  %v516_v32 = vperm.slane %v880_v14, 7 }
 0x187   : > { %v463_v48 = vpop.permute.xlu1 %462 }
 0x188   : > { %v465_v49 = vsel %vm464_vm4, %v463_v48, %v460_v47  ;;  %v468_v50 = vsel %vm464_vm4, %v460_v47, %v463_v48 }
 0x189   : > { %v471_v53 = vmul.f32 %v469_v45, %v468_v50  ;;  %v472_v54 = vmul.f32 %v470_v46, %v465_v49 }
 0x18b   : > { %v474_v55 = vadd.f32 %v472_v54, %v458_v52  ;;  %v473_v56 = vadd.f32 %v471_v53, %v457_v51 }
 0x18d   : > { %v476_v57 = vmul.f32 0.25, %v474_v55  ;;  %v475_v58 = vmul.f32 0.25, %v473_v56 }
 0x18f   : > { %482 = vrot.lane.b32.xlu2 %v476_v57, %s701_s16  ;;  %499 = vrot.lane.b32.xlu1 %v475_v58, %s702_s17  ;;  %v480_v9 = vmul.f32 %v478_v61, %v476_v57  ;;  %v479_v12 = vmul.f32 %v477_v60, %v475_v58 }
 0x190   : > { %486 = vrot.lane.b32.xlu0 %v475_v58, %s701_s16 }
 0x197   : > { %501 = vrot.lane.b32.xlu2 %v476_v57, %s702_s17 }
 0x1e9   : > { %v483_v59 = vpop.permute.xlu2 %482 }
 0x1f1   : > { %v502_v1 = vpop.permute.xlu2 %501 }
 0x201   : > { %v500_v0 = vpop.permute.xlu1 %499 }
 0x202   : > { %v487_v4 = vpop.permute.xlu0 %486  ;;  %v504_v5 = vsel %vm503_vm5, %v500_v0, %v502_v1  ;;  %v508_v6 = vsel %vm503_vm5, %v502_v1, %v500_v0 }
 0x203   : > { %v489_v7 = vsel %vm488_vm6, %v487_v4, %v483_v59  ;;  %v492_v8 = vsel %vm488_vm6, %v483_v59, %v487_v4  ;;  %v511_v17 = vmul.f32 %v509_v2, %v504_v5  ;;  %v512_v18 = vmul.f32 %v510_v3, %v508_v6 }
 0x204   : > { %v495_v15 = vmul.f32 %v493_v62, %v492_v8  ;;  %v496_v16 = vmul.f32 %v494_v63, %v489_v7 }
 0x206   : > { %v497_v19 = vadd.f32 %v495_v15, %v479_v12  ;;  %v498_v20 = vadd.f32 %v496_v16, %v480_v9 }
 0x208   : > { %v514_v21 = vadd.f32 %v512_v18, %v498_v20  ;;  %v513_v22 = vadd.f32 %v511_v17, %v497_v19 }
 0x20a   : > { %520 = vrot.lane.b32.xlu0 %v514_v21, %s703_s18  ;;  %537 = vrot.lane.b32.xlu2 %v513_v22, %s704_s19  ;;  %v518_v38 = vmul.f32 %v516_v32, %v514_v21  ;;  %v517_v39 = vmul.f32 %v515_v31, %v513_v22 }
 0x20b   : > { %524 = vrot.lane.b32.xlu1 %v513_v22, %s703_s18 }
 0x212   : > { %539 = vrot.lane.b32.xlu0 %v514_v21, %s704_s19 }
 0x264   : > { %v538_v37 = vpop.permute.xlu2 %537 }
 0x27c   : > { %v521_v25 = vpop.permute.xlu0 %520 }
 0x27d   : > { %v525_v26 = vpop.permute.xlu1 %524 }
 0x27e   : > { %v527_v29 = vsel %vm526_vm7, %v525_v26, %v521_v25  ;;  %v530_v30 = vsel %vm526_vm7, %v521_v25, %v525_v26 }
 0x27f   : > { %v533_v33 = vmul.f32 %v531_v27, %v530_v30  ;;  %v534_v34 = vmul.f32 %v532_v28, %v527_v29 }
 0x281   : > { %v535_v43 = vadd.f32 %v533_v33, %v517_v39  ;;  %v536_v44 = vadd.f32 %v534_v34, %v518_v38 }
 0x284   : > { %v540_v40 = vpop.permute.xlu0 %539 }
 0x285   : > { %v542_v41 = vsel %vm541_vm8, %v538_v37, %v540_v40  ;;  %v546_v42 = vsel %vm541_vm8, %v540_v40, %v538_v37 }
 0x286   : > { %v549_v45 = vmul.f32 %v547_v35, %v542_v41  ;;  %v550_v46 = vmul.f32 %v548_v36, %v546_v42 }
 0x288   : > { %v551_v13 = vadd.f32 %v549_v45, %v535_v43  ;;  %v552_v47 = vadd.f32 %v550_v46, %v536_v44 }
 0x28a   : > { %v553_v14 = vsub.f32 %v862_v10, %v551_v13  ;;  %v554_v48 = vsub.f32 %v864_v11, %v552_v47 }
 0x28c   : > { %v555_v49 = vand.u32 2147483647, %v553_v14  ;;  %v556_v50 = vand.u32 2147483647, %v554_v48 }
 0x28e   : > { %557 = vst [vmem:[%s262_s29] sm:$0xff] %v555_v49 }
 0x28f   : > { %558 = vst [vmem:[%s262_s29 + $0x8] sm:$0xff] %v556_v50 }
 0x290 PF: > { %s17_s21 = sadd.s32 1, %s691_s21  }
 0x291   : > { %p14_p4 = scmp.ge.s32.totalorder %s17_s21, 4  }
 0x293   :  { %16 = sbr.rel (!%p14_p4) target bundleno = 1 (0x1), region = 82 }

</bundles_post_ra>
